<compile_context>
chip_gen: v7x
topology: tpu7x:2x2x1
jax: 0.10.0
libtpu: 0.0.40
codegen_flags: <defaults>
</compile_context>

<pallas_src>
import jax
import jax.numpy as jnp
from jax.experimental import pallas as pl
from jax.experimental.pallas import tpu as pltpu

_MXU_MIN_K = 64  # below this contraction size, use VPU FMAs instead of the MXU


def _pick_lane_tile(hw, max_tl=4096):
    """Lane tile over the spatial axis: lane-dense (multiple of 128) and big."""
    if hw <= max_tl or hw % 128 != 0:
        return hw  # full extent (always legal as a block dim)
    for tl in range(max_tl - max_tl % 128, 127, -128):
        if hw % tl == 0:
            return tl
    return hw


def _linear_conv_kernel(x_ref, w_ref, shift_ref, o_ref):
    # x_ref:     (1, Cin, TL)   input pixels, lanes = spatial (lane-dense)
    # w_ref:     (Cout, Cin)    conv weight with BN scale folded in (resident)
    # shift_ref: (Cout, 1)      folded BN shift / bias (resident)
    # o_ref:     (1, Cout, TL)  output pixels, lanes = spatial (lane-dense)
    cout, cin = w_ref.shape
    tl = o_ref.shape[-1]
    x = x_ref[0]                     # (Cin, TL)
    shift = shift_ref[...]           # (Cout, 1), broadcasts over lanes

    if cin >= _MXU_MIN_K:
        # Large contraction: worth feeding the MXU.
        y = jnp.dot(w_ref[...], x, preferred_element_type=jnp.float32) + shift
    else:
        # Tiny Cin: statically-unrolled VPU broadcast multiply-accumulate.
        y = jnp.broadcast_to(shift, (cout, tl)).astype(jnp.float32)
        for ci in range(cin):
            y = y + w_ref[:, ci:ci + 1] * x[ci:ci + 1, :]

    o_ref[0] = jnp.maximum(y, 0.0).astype(o_ref.dtype)


@jax.jit
def linear_conv(x_nchw, conv_w, bn_gamma, bn_beta, bn_mean, bn_var, eps=1e-5):
    """1x1 Conv2d (no bias) + BatchNorm2d (eval) + ReLU, NCHW in/out."""
    n, cin, h, w = x_nchw.shape
    cout = conv_w.shape[0]
    hw = h * w
    m = n * hw

    # Channels-first view: (N, Cin, H*W) — a pure reshape of NCHW.
    x3d = x_nchw.reshape(n, cin, hw).astype(jnp.float32)

    # Fold BatchNorm (inference) into the weight (scale) and a bias (shift).
    inv_std = jax.lax.rsqrt(bn_var.astype(jnp.float32) + eps)
    scale = bn_gamma.astype(jnp.float32) * inv_std                      # (Cout,)
    shift = (bn_beta.astype(jnp.float32)
             - bn_mean.astype(jnp.float32) * scale).reshape(cout, 1)    # (Cout, 1)
    w2d = conv_w.reshape(cout, cin).astype(jnp.float32) * scale[:, None]  # (Cout, Cin)

    tl = _pick_lane_tile(hw)
    grid = (n, hw // tl)

    cost = pl.CostEstimate(
        flops=2 * m * cin * cout,
        transcendentals=0,
        bytes_accessed=4 * (m * cin + cin * cout + cout + m * cout),
    )

    out3d = pl.pallas_call(
        _linear_conv_kernel,
        out_shape=jax.ShapeDtypeStruct((n, cout, hw), jnp.float32),
        grid=grid,
        in_specs=[
            pl.BlockSpec((1, cin, tl), lambda b, l: (b, 0, l)),
            pl.BlockSpec((cout, cin), lambda b, l: (0, 0)),  # constant, stays resident
            pl.BlockSpec((cout, 1), lambda b, l: (0, 0)),    # constant, stays resident
        ],
        out_specs=pl.BlockSpec((1, cout, tl), lambda b, l: (b, 0, l)),
        compiler_params=pltpu.CompilerParams(
            dimension_semantics=("parallel", "parallel")),
        cost_estimate=cost,
    )(x3d, w2d, shift)

    # (N, Cout, H*W) -> NCHW (pure reshape).
    return out3d.reshape(n, cout, h, w)


def _reference(x_nchw, conv_w, bn_gamma, bn_beta, bn_mean, bn_var, eps=1e-5):
    # Pure-JAX reference: 1x1 conv + eval-mode BN + ReLU in NCHW.
    y = jnp.einsum("nchw,oc->nohw", x_nchw.astype(jnp.float32),
                   conv_w.reshape(conv_w.shape[0], conv_w.shape[1]).astype(jnp.float32))
    inv_std = 1.0 / jnp.sqrt(bn_var + eps)
    scale = (bn_gamma * inv_std)[None, :, None, None]
    shift = (bn_beta - bn_mean * bn_gamma * inv_std)[None, :, None, None]
    return jnp.maximum(y * scale + shift, 0.0)


if __name__ == "__main__":
    # Small shapes consistent with the module: batch=2, in_channels=4,
    # out_channels=8, spatial=16x16.
    N, CIN, COUT, H, W = 2, 4, 8, 16, 16

    key = jax.random.PRNGKey(0)
    kx, kw, kg, kb, km, kv = jax.random.split(key, 6)

    x = jax.random.normal(kx, (N, CIN, H, W), dtype=jnp.float32)
    conv_w = jax.random.normal(kw, (COUT, CIN, 1, 1), dtype=jnp.float32) * 0.1
    bn_gamma = 1.0 + 0.1 * jax.random.normal(kg, (COUT,), dtype=jnp.float32)
    bn_beta = 0.1 * jax.random.normal(kb, (COUT,), dtype=jnp.float32)
    bn_mean = 0.1 * jax.random.normal(km, (COUT,), dtype=jnp.float32)
    bn_var = jnp.abs(1.0 + 0.1 * jax.random.normal(kv, (COUT,), dtype=jnp.float32))

    out = linear_conv(x, conv_w, bn_gamma, bn_beta, bn_mean, bn_var)
    out = jax.block_until_ready(out)

    ref = _reference(x, conv_w, bn_gamma, bn_beta, bn_mean, bn_var)
    assert out.shape == (N, COUT, H, W)
    assert jnp.allclose(out, ref, atol=1e-4, rtol=1e-4), "mismatch vs reference"

    print("KERNEL_OK")
</pallas_src>

<mosaic_0001>
module attributes {stable_mosaic.version = 11 : i64} {
  func.func @_linear_conv_kernel(%arg0: i32, %arg1: i32, %arg2: memref<1x4x256xf32, #tpu.memory_space<vmem>>, %arg3: memref<8x4xf32, #tpu.memory_space<vmem>>, %arg4: memref<8x1xf32, #tpu.memory_space<vmem>>, %arg5: memref<1x8x256xf32, #tpu.memory_space<vmem>>) attributes {dimension_semantics = [#tpu.dimension_semantics<parallel>, #tpu.dimension_semantics<parallel>], iteration_bounds = array<i64: 2, 1>, scalar_prefetch = 0 : i64, scratch_operands = 0 : i64, tpu.core_type = #tpu.core_type<tc>, window_params = [{transform_indices = @transform_0, window_bounds = array<i64: 1, 4, 256>}, {pipeline_mode = #tpu.pipeline_mode<synchronous>, transform_indices = @transform_1, window_bounds = array<i64: 8, 4>}, {pipeline_mode = #tpu.pipeline_mode<synchronous>, transform_indices = @transform_2, window_bounds = array<i64: 8, 1>}, {transform_indices = @transform_3, window_bounds = array<i64: 1, 8, 256>}]} {
    %c0 = arith.constant 0 : index
    %c0_0 = arith.constant 0 : index
    %c0_1 = arith.constant 0 : index
    %0 = vector.load %arg2[%c0, %c0_0, %c0_1] : memref<1x4x256xf32, #tpu.memory_space<vmem>>, vector<1x4x256xf32>
    %1 = vector.shape_cast %0 : vector<1x4x256xf32> to vector<4x256xf32>
    %c0_2 = arith.constant 0 : index
    %c0_3 = arith.constant 0 : index
    %2 = vector.load %arg4[%c0_2, %c0_3] : memref<8x1xf32, #tpu.memory_space<vmem>>, vector<8x1xf32>
    %3 = vector.shape_cast %2 : vector<8x1xf32> to vector<8x1xf32>
    %4 = vector.broadcast %3 : vector<8x1xf32> to vector<8x256xf32>
    %c0_4 = arith.constant 0 : index
    %c0_5 = arith.constant 0 : index
    %5 = vector.load %arg3[%c0_4, %c0_5] : memref<8x4xf32, #tpu.memory_space<vmem>>, vector<8x1xf32>
    %6 = vector.extract_strided_slice %1 {offsets = [0, 0], sizes = [1, 256], strides = [1, 1]} : vector<4x256xf32> to vector<1x256xf32>
    %7 = vector.broadcast %5 : vector<8x1xf32> to vector<8x256xf32>
    %8 = vector.broadcast %6 : vector<1x256xf32> to vector<8x256xf32>
    %9 = arith.mulf %7, %8 : vector<8x256xf32>
    %10 = arith.addf %4, %9 : vector<8x256xf32>
    %c0_6 = arith.constant 0 : index
    %c1 = arith.constant 1 : index
    %11 = vector.load %arg3[%c0_6, %c1] : memref<8x4xf32, #tpu.memory_space<vmem>>, vector<8x1xf32>
    %12 = vector.extract_strided_slice %1 {offsets = [1, 0], sizes = [1, 256], strides = [1, 1]} : vector<4x256xf32> to vector<1x256xf32>
    %13 = vector.broadcast %11 : vector<8x1xf32> to vector<8x256xf32>
    %14 = vector.broadcast %12 : vector<1x256xf32> to vector<8x256xf32>
    %15 = arith.mulf %13, %14 : vector<8x256xf32>
    %16 = arith.addf %10, %15 : vector<8x256xf32>
    %c0_7 = arith.constant 0 : index
    %c2 = arith.constant 2 : index
    %17 = vector.load %arg3[%c0_7, %c2] : memref<8x4xf32, #tpu.memory_space<vmem>>, vector<8x1xf32>
    %18 = vector.extract_strided_slice %1 {offsets = [2, 0], sizes = [1, 256], strides = [1, 1]} : vector<4x256xf32> to vector<1x256xf32>
    %19 = vector.broadcast %17 : vector<8x1xf32> to vector<8x256xf32>
    %20 = vector.broadcast %18 : vector<1x256xf32> to vector<8x256xf32>
    %21 = arith.mulf %19, %20 : vector<8x256xf32>
    %22 = arith.addf %16, %21 : vector<8x256xf32>
    %c0_8 = arith.constant 0 : index
    %c3 = arith.constant 3 : index
    %23 = vector.load %arg3[%c0_8, %c3] : memref<8x4xf32, #tpu.memory_space<vmem>>, vector<8x1xf32>
    %24 = vector.extract_strided_slice %1 {offsets = [3, 0], sizes = [1, 256], strides = [1, 1]} : vector<4x256xf32> to vector<1x256xf32>
    %25 = vector.broadcast %23 : vector<8x1xf32> to vector<8x256xf32>
    %26 = vector.broadcast %24 : vector<1x256xf32> to vector<8x256xf32>
    %27 = arith.mulf %25, %26 : vector<8x256xf32>
    %28 = arith.addf %22, %27 : vector<8x256xf32>
    %cst = arith.constant 0.000000e+00 : f32
    %29 = vector.broadcast %cst : f32 to vector<8x256xf32>
    %30 = arith.maximumf %28, %29 : vector<8x256xf32>
    %c0_9 = arith.constant 0 : index
    %c0_10 = arith.constant 0 : index
    %c0_11 = arith.constant 0 : index
    %31 = vector.load %arg5[%c0_9, %c0_10, %c0_11] : memref<1x8x256xf32, #tpu.memory_space<vmem>>, vector<1x8x256xf32>
    %32 = vector.shape_cast %31 : vector<1x8x256xf32> to vector<8x256xf32>
    %33 = vector.shape_cast %30 : vector<8x256xf32> to vector<1x8x256xf32>
    tpu.vector_store %arg5[%c0_9, %c0_10, %c0_11], %33 {strides = array<i32>} : memref<1x8x256xf32, #tpu.memory_space<vmem>>, vector<1x8x256xf32>,
    return
  }
  func.func @transform_0(%arg0: i32, %arg1: i32) -> (i32, i32, i32) {
    %c0_i32 = arith.constant 0 : i32
    %c0_i32_0 = arith.constant 0 : i32
    return %arg0, %c0_i32, %arg1 : i32, i32, i32
  }
  func.func @transform_1(%arg0: i32, %arg1: i32) -> (i32, i32) {
    %c0_i32 = arith.constant 0 : i32
    %c0_i32_0 = arith.constant 0 : i32
    %c0_i32_1 = arith.constant 0 : i32
    return %c0_i32, %c0_i32_0 : i32, i32
  }
  func.func @transform_2(%arg0: i32, %arg1: i32) -> (i32, i32) {
    %c0_i32 = arith.constant 0 : i32
    %c0_i32_0 = arith.constant 0 : i32
    %c0_i32_1 = arith.constant 0 : i32
    return %c0_i32, %c0_i32_0 : i32, i32
  }
  func.func @transform_3(%arg0: i32, %arg1: i32) -> (i32, i32, i32) {
    %c0_i32 = arith.constant 0 : i32
    %c0_i32_0 = arith.constant 0 : i32
    return %arg0, %c0_i32, %arg1 : i32, i32, i32
  }
}

</mosaic_0001>

<bundles_post_ra>
// kernel: linear_conv.1
= control target key start
LH: loop header
LB: loop body
LE: loop exit
PB: predicated region body
PF: predicated region fallthrough
CT: control target
= control target key end

     0   :  { %s508_s12 = smov 0   ;;  %s510_s13 = smov 0   ;;  %s551_s0 = inlined_call_operand.vmem [shape: f32[2,4,256], index: 0, kind: input, shape index: {}]   ;;  %s552_s1 = inlined_call_operand.vmem [shape: f32[8,4], index: 1, kind: input, shape index: {}]   ;;  %s553_s2 = inlined_call_operand.vmem [shape: f32[8,1], index: 2, kind: input, shape index: {}]   ;;  %s554_s3 = inlined_call_operand.vmem [shape: f32[2,8,256], index: 3, kind: output, shape index: {}]  }
   0x1   :  { %s512_s14 = smov 0  }
   0x2 LB: > { %s25_s15 = sadd.s32 1, %s478_s13  ;;  %p419_p0 = scmp.ge.s32.totalorder %s482_s14, 1  ;;  %s482_s14 = sphi %s512_s14, %s13_s14   ;;  %s478_s13 = sphi %s510_s13, %s556_s13   ;;  %s474_s12 = sphi %s508_s12, %s555_s12  }
   0x3   : > { %p27_p1 = scmp.ge.s32.totalorder %s25_s15, 2  ;;  %p158_p2 = scmp.lt.s32.totalorder %s482_s14, 3 }
   0x5   : > { %s558_s15 = smov (%p27_p1, %s25_s15), 0  ;;  %p159_p3 = pnand %p419_p0, %p158_p2 }
   0x6   : > { %v217_v0 = vld [vmem:[%s552_s1] sm:$0xff] (!%p159_p3)  ;;  %v484_v1 = vmov (!%p159_p3), 0   ;;  %v485_v2 = vmov (!%p159_p3), 1   ;;  %v486_v4 = vmov (!%p159_p3), 2   ;;  %v487_v5 = vmov (!%p159_p3), 3   ;;  %p191_p4 = scmp.lt.s32.totalorder (!%p159_p3), %s474_s12, 1 }
   0x7   : > { %162 = sbr.rel (%p159_p3) target bundleno = 152 (0x98), region = 32  ;;  %456 = vset.pattern.permute.xlu0 (!%p159_p3), %v484_v1  ;;  %457 = vset.pattern.permute.xlu1 (!%p159_p3), %v485_v2  ;;  %v211_v3 = vld [vmem:[%s553_s2] sm:$0xff] (!%p159_p3)  ;;  %v224_v6 = vlaneseq (!%p159_p3) }
   0x8   : > { %220 = vperm.xlu0 (!%p159_p3), %456, %v217_v0   ;;  %247 = vperm.xlu1 (!%p159_p3), %457, %v217_v0  }
   0x9   : > { %v225_v7 = vshrl.u32 (!%p159_p3), %v224_v6, 7 }
   0xb   : > { %v226_v8 = vsub.s32 (!%p159_p3), 0, %v225_v7  ;;  %v230_v9 = vsub.s32 (!%p159_p3), 4, %v225_v7  ;;  %v252_v11 = vsub.s32 (!%p159_p3), 1, %v225_v7  ;;  %v256_v12 = vsub.s32 (!%p159_p3), 5, %v225_v7 }
   0xc   : > { %214 = vperm.xlu0 (!%p159_p3), %456, %v211_v3   ;;  %458 = vset.pattern.permute.xlu1 (!%p159_p3), %v486_v4  ;;  %v278_v13 = vsub.s32 (!%p159_p3), 2, %v225_v7  ;;  %v282_v14 = vsub.s32 (!%p159_p3), 6, %v225_v7  ;;  %v304_v21 = vsub.s32 (!%p159_p3), 3, %v225_v7  ;;  %v308_v22 = vsub.s32 (!%p159_p3), 7, %v225_v7 }
   0xd   : > { %273 = vperm.xlu1 (!%p159_p3), %458, %v217_v0  }
   0xe   : > { %s560_s12 = smov (!%p191_p4, %s474_s12), 1 }
   0xf   : > { %s426_s20 = sshll.u32 %s560_s12, 3  ;;  %s427_s24 = sshll.u32 %s560_s12, 4 }
  0x10   : > { %459 = vset.pattern.permute.xlu0 %v487_v5  ;;  %s198_s23 = scalar_lea.vmem %s551_s0, %s426_s20  ;;  %s208_s27 = scalar_lea.vmem %s554_s3, %s427_s24 }
  0x11   : > { %299 = vperm.xlu0 %459, %v217_v0   ;;  %v210_v10 = vld [vmem:[%s198_s23] sm:$0xff] }
  0x12   : > { %v227_v15 = vrot.slane %v210_v10, %v226_v8  ;;  %v231_v16 = vrot.slane %v210_v10, %v230_v9  ;;  %v253_v17 = vrot.slane %v210_v10, %v252_v11  ;;  %v257_v18 = vrot.slane %v210_v10, %v256_v12 }
  0x13   : > { %v279_v19 = vrot.slane %v210_v10, %v278_v13  ;;  %v283_v20 = vrot.slane %v210_v10, %v282_v14  ;;  %v305_v31 = vrot.slane %v210_v10, %v304_v21  ;;  %v309_v32 = vrot.slane %v210_v10, %v308_v22 }
  0x14   : > { %v237_v23 = vrot.slane %v227_v15, %v226_v8  ;;  %v241_v24 = vrot.slane %v231_v16, %v226_v8  ;;  %v263_v27 = vrot.slane %v253_v17, %v252_v11  ;;  %v267_v28 = vrot.slane %v257_v18, %v252_v11 }
  0x15   : > { %v289_v29 = vrot.slane %v279_v19, %v278_v13  ;;  %v293_v30 = vrot.slane %v283_v20, %v278_v13  ;;  %v315_v43 = vrot.slane %v305_v31, %v304_v21  ;;  %v319_v44 = vrot.slane %v309_v32, %v304_v21 }
  0x87   : > { %v221_v25 = vpop.permute.xlu0 %220  ;;  %v248_v26 = vpop.permute.xlu1 %247 }
  0x88   : > { %v242_v33 = vmul.f32 %v237_v23, %v221_v25  ;;  %v243_v34 = vmul.f32 %v241_v24, %v221_v25  ;;  %v268_v36 = vmul.f32 %v263_v27, %v248_v26  ;;  %v269_v37 = vmul.f32 %v267_v28, %v248_v26 }
  0x8b   : > { %v215_v35 = vpop.permute.xlu0 %214 }
  0x8c   : > { %v244_v38 = vadd.f32 %v242_v33, %v215_v35  ;;  %v245_v39 = vadd.f32 %v243_v34, %v215_v35  ;;  %v274_v40 = vpop.permute.xlu1 %273 }
  0x8d   : > { %v294_v41 = vmul.f32 %v289_v29, %v274_v40  ;;  %v295_v42 = vmul.f32 %v293_v30, %v274_v40 }
  0x8e   : > { %v270_v45 = vadd.f32 %v268_v36, %v244_v38  ;;  %v271_v46 = vadd.f32 %v269_v37, %v245_v39 }
  0x90   : > { %v296_v47 = vadd.f32 %v294_v41, %v270_v45  ;;  %v297_v48 = vadd.f32 %v295_v42, %v271_v46  ;;  %v300_v49 = vpop.permute.xlu0 %299 }
  0x91   : > { %v320_v50 = vmul.f32 %v315_v43, %v300_v49  ;;  %v321_v51 = vmul.f32 %v319_v44, %v300_v49 }
  0x93   : > { %v322_v52 = vadd.f32 %v320_v50, %v296_v47  ;;  %v323_v53 = vadd.f32 %v321_v51, %v297_v48 }
  0x95   : > { %v324_v54 = vmax.f32 %v322_v52, 0.0  ;;  %v325_v55 = vmax.f32 %v323_v53, 0.0 }
  0x97   : > { %326 = vst [vmem:[%s208_s27] sm:$0xff] %v324_v54  ;;  %327 = vst [vmem:[%s208_s27 + $0x8] sm:$0xff] %v325_v55 }
  0x98 PF: > { %s13_s14 = sadd.s32 1, %s482_s14   ;;  %s555_s12 = smov %s478_s13 }
  0x99   : > { %p10_p5 = scmp.ge.s32.totalorder %s13_s14, 4   ;;  %s556_s13 = smov %s558_s15 }
  0x9b   :  { %12 = sbr.rel (!%p10_p5) target bundleno = 2 (0x2), region = 62 }

</bundles_post_ra>
